<compile_context>
chip_gen: v5e
topology: v5e:2x2
jax: 0.10.0
libtpu: 0.0.40
codegen_flags: <defaults>
</compile_context>

<pallas_src>
import jax
import jax.numpy as jnp
from jax.experimental import pallas as pl
from jax.experimental.pallas import tpu as pltpu

IN_CHANNELS = 3
_VMEM_LIMIT = 32 * 1024 * 1024       # explicit scoped-VMEM budget (defaults: 16 MiB v5e, 32 MiB v6e/v7x)
_VMEM_LIMIT_MAX = 60 * 1024 * 1024   # stay under v7x's 64 MiB physical VMEM
_BLOCK_BUDGET = 4 * 1024 * 1024      # per-step input-block budget


def _round_up(v, m):
    return (v + m - 1) // m * m


def _row_tile(rows, row_tile):
    """Row tile: large (amortize ~0.35us/step overhead), multiple of 16 (bf16
    sublane packing), capped at ceil(rows/2) so the single 'parallel' grid
    axis has >=2 steps whenever possible (v7x has 2 TensorCores)."""
    t = min(row_tile, _round_up(max(pl.cdiv(rows, 2), 1), 16))
    return max(t, 16)


# --------------------------------------------------------------------------
# Conv2d(stride1, VALID) + bias + ReLU + MaxPool(pool, pool) as one kernel.
# rows = pooled output pixels, cols = im2col features; the pool-window axis is
# folded into the block and reduced in-kernel (no grid reduction / output RMW).
# --------------------------------------------------------------------------
def _make_conv_relu_pool_kernel(n_win):
    def kernel(xcol_ref, w_ref, b_ref, o_ref):
        # xcol: (n_win, TG, K) bf16 | w: (K, Cp) bf16 | b: (1, Cp) f32
        # o:    (TG, Cp) bf16
        w = w_ref[...]
        b = b_ref[...]
        acc = None
        for d in range(n_win):                      # small static unroll
            y = jnp.dot(xcol_ref[d], w, preferred_element_type=jnp.float32)
            y = jnp.maximum(y + b, 0.0)             # conv + bias + ReLU
            acc = y if acc is None else jnp.maximum(acc, y)   # max-pool
        o_ref[...] = acc.astype(o_ref.dtype)
    return kernel


def conv_relu_pool(x_nhwc, w, b, pool, *, row_tile=2048):
    """x_nhwc: (N,H,W,Cin) f32 or bf16; w: (Cout,Cin,KH,KW) PyTorch layout;
    b: (Cout,).  Returns channels-last (N, Hp, Wp, Cout), bfloat16."""
    B, H, W, Cin = x_nhwc.shape
    Cout, Cin2, KH, KW = w.shape
    assert Cin == Cin2
    Ho, Wo = H - KH + 1, W - KW + 1
    Hp, Wp = Ho // pool, Wo // pool          # MaxPool2d floors
    Hc, Wc = Hp * pool, Wp * pool

    n_win = pool * pool
    G = B * Hp * Wp
    K = KH * KW * Cin

    # --- im2col glue: stride-`pool` slices, no transpose, no K padding ------
    xb = x_nhwc.astype(jnp.bfloat16)
    wins = []
    for dh in range(pool):
        for dw in range(pool):
            feats = [xb[:, kh + dh:kh + dh + Hc:pool,
                        kw + dw:kw + dw + Wc:pool, :]
                     for kh in range(KH) for kw in range(KW)]
            wins.append(jnp.concatenate(feats, axis=-1).reshape(G, K))
    xcol = jnp.stack(wins, axis=0)           # (n_win, G, K), cols (kh,kw,cin)

    # --- tiling --------------------------------------------------------------
    TG = _row_tile(G, row_tile)
    max_rows = max(16, (_BLOCK_BUDGET // (n_win * K * 2)) // 16 * 16)
    TG = min(TG, max_rows)                   # keep xcol block a few MiB max
    n_tiles = pl.cdiv(G, TG)
    Gp = n_tiles * TG
    Cp = _round_up(Cout, 128)
    if Gp > G:
        xcol = jnp.pad(xcol, ((0, 0), (0, Gp - G), (0, 0)))

    # weight rows ordered (kh, kw, cin) to match the im2col columns
    w_col = w.transpose(2, 3, 1, 0).reshape(K, Cout).astype(jnp.bfloat16)
    w_col = jnp.pad(w_col, ((0, 0), (0, Cp - Cout)))
    b2 = jnp.pad(b.astype(jnp.float32).reshape(1, Cout), ((0, 0), (0, Cp - Cout)))

    vmem_bytes = (2 * n_win * TG * K * 2            # double-buffered xcol block
                  + 2 * (K * Cp * 2 + Cp * 4)       # resident weight + bias
                  + 2 * TG * Cp * 2                 # output block (bf16)
                  + 3 * TG * Cp * 4)                # f32 y/acc headroom
    vmem_limit = min(max(_VMEM_LIMIT, int(vmem_bytes * 1.25)), _VMEM_LIMIT_MAX)

    pooled = pl.pallas_call(
        _make_conv_relu_pool_kernel(n_win),
        out_shape=jax.ShapeDtypeStruct((Gp, Cp), jnp.bfloat16),
        grid=(n_tiles,),
        in_specs=[
            pl.BlockSpec((n_win, TG, K), lambda g: (0, g, 0)),
            pl.BlockSpec((K, Cp), lambda g: (0, 0)),
            pl.BlockSpec((1, Cp), lambda g: (0, 0)),
        ],
        out_specs=pl.BlockSpec((TG, Cp), lambda g: (g, 0)),
        compiler_params=pltpu.CompilerParams(
            dimension_semantics=("parallel",),
            vmem_limit_bytes=vmem_limit),
    )(xcol, w_col, b2)

    # rows ordered (n, ph, pw) -> channels-last output, padding sliced off
    return pooled[:G, :Cout].reshape(B, Hp, Wp, Cout)


# --------------------------------------------------------------------------
# Fused MLP: x @ W1 (+b1, relu) @ W2 ... in one pallas_call.  Intermediates
# stay on-chip; all matmuls bf16 x bf16 -> f32.
# --------------------------------------------------------------------------
def _make_mlp_kernel(n_layers, relu_flags):
    def kernel(*refs):
        o_ref = refs[-1]
        h = refs[0][...]                                  # (TM, K) bf16
        for i in range(n_layers):
            w = refs[1 + 2 * i][...]                      # (K_i, Np_i) bf16
            b = refs[2 + 2 * i][...]                      # (1, Np_i) f32
            y = jnp.dot(h, w, preferred_element_type=jnp.float32) + b
            if relu_flags[i]:
                y = jnp.maximum(y, 0.0)
            h = y.astype(jnp.bfloat16) if i < n_layers - 1 else y
        o_ref[...] = h.astype(o_ref.dtype)
    return kernel


def mlp(x, layers, *, row_tile=2048):
    """Fused linear stack. x: (M, K); layers: [(w (out,in), b (out,), relu)]."""
    M, K = x.shape
    n_layers = len(layers)
    relu_flags = tuple(bool(r) for (_, _, r) in layers)

    TM = _row_tile(M, row_tile)
    max_rows = max(16, (_BLOCK_BUDGET // (K * 2)) // 16 * 16)
    TM = min(TM, max_rows)
    n_tiles = pl.cdiv(M, TM)
    Mp = n_tiles * TM
    xp = x.astype(jnp.bfloat16)
    if Mp > M:
        xp = jnp.pad(xp, ((0, Mp - M), (0, 0)))           # rows only; K unpadded

    args = [xp]
    in_specs = [pl.BlockSpec((TM, K), lambda m: (m, 0))]
    vmem_bytes = 2 * TM * K * 2                           # double-buffered input
    in_dim = K
    k_kernel = K                                          # width the kernel sees
    for (w, b, _) in layers:
        out_f, in_f = w.shape
        assert in_f == in_dim, (in_f, in_dim)
        Np = _round_up(out_f, 128)
        wp = jnp.transpose(w).astype(jnp.bfloat16)        # (in_f, out_f)
        wp = jnp.pad(wp, ((0, k_kernel - in_f), (0, Np - out_f)))
        bp = jnp.pad(b.astype(jnp.float32).reshape(1, out_f),
                     ((0, 0), (0, Np - out_f)))
        args += [wp, bp]
        in_specs += [pl.BlockSpec((k_kernel, Np), lambda m: (0, 0)),
                     pl.BlockSpec((1, Np), lambda m: (0, 0))]
        vmem_bytes += 2 * (k_kernel * Np * 2 + Np * 4)    # resident weight + bias
        vmem_bytes += 2 * TM * Np * 4                     # live intermediate
        in_dim = out_f
        k_kernel = Np                                     # next layer's padded width

    n_out = layers[-1][0].shape[0]
    Noutp = _round_up(n_out, 128)
    vmem_bytes += 2 * TM * Noutp * 4
    vmem_limit = min(max(_VMEM_LIMIT, int(vmem_bytes * 1.25)), _VMEM_LIMIT_MAX)

    out = pl.pallas_call(
        _make_mlp_kernel(n_layers, relu_flags),
        out_shape=jax.ShapeDtypeStruct((Mp, Noutp), jnp.float32),
        grid=(n_tiles,),
        in_specs=in_specs,
        out_specs=pl.BlockSpec((TM, Noutp), lambda m: (m, 0)),
        compiler_params=pltpu.CompilerParams(
            dimension_semantics=("parallel",),
            vmem_limit_bytes=vmem_limit),
    )(*args)
    return out[:M, :n_out]


def _nhwc_fc_weight(w, c, h, wd):
    """Reorder an FC weight's input dim from PyTorch (c,h,w) flatten order to
    the (h,w,c) order produced by flattening our channels-last activations."""
    out_f = w.shape[0]
    assert w.shape[1] == c * h * wd
    return w.reshape(out_f, c, h, wd).transpose(0, 2, 3, 1).reshape(out_f, -1)


# --------------------------------------------------------------------------
# Deterministic parameter init (PyTorch default: U(-1/sqrt(fan_in), +...))
# --------------------------------------------------------------------------
def init_linear_params(key, fan_in, fan_out):
    k1, k2 = jax.random.split(key)
    bound = 1.0 / float(fan_in) ** 0.5
    w = jax.random.uniform(k1, (fan_out, fan_in), jnp.float32, -bound, bound)
    b = jax.random.uniform(k2, (fan_out,), jnp.float32, -bound, bound)
    return w, b  # PyTorch layout (out_features, in_features)


def init_conv_params(key, cin, cout, kd):
    k1, k2 = jax.random.split(key)
    fan_in = cin * kd * kd
    bound = 1.0 / float(fan_in) ** 0.5
    w = jax.random.uniform(k1, (cout, cin, kd, kd), jnp.float32, -bound, bound)
    b = jax.random.uniform(k2, (cout,), jnp.float32, -bound, bound)
    return w, b  # PyTorch layout (Cout, Cin, KH, KW)


# --------------------------------------------------------------------------
# Net (mirrors hw4/deep.py)
# --------------------------------------------------------------------------
class Net:
    def __init__(self, part, out_channels, kernal_d, N, key):
        self.part = part
        ks = jax.random.split(key, 8)
        if part == 'a':
            self.a_fc = init_linear_params(ks[0], 32 * 32 * IN_CHANNELS, 10)
        elif part == 'b':
            self.a_fc = init_linear_params(ks[0], 32 * 32 * IN_CHANNELS, out_channels)
            self.h1_fc = init_linear_params(ks[1], out_channels, 10)
        elif part == 'c':
            self.convC = init_conv_params(ks[0], IN_CHANNELS, out_channels, kernal_d)
            self.poolN = N
            self.dim = int((32 - kernal_d + 1) / N)
            self.flat_fc = init_linear_params(
                ks[1], out_channels * self.dim * self.dim, 10)
        else:  # default / 'd' branch (LeNet-style)
            self.conv1 = init_conv_params(ks[0], IN_CHANNELS, out_channels, kernal_d)
            self.conv2 = init_conv_params(ks[1], out_channels, 16, kernal_d)
            self.fc1 = init_linear_params(ks[2], 16 * kernal_d * kernal_d, 120)
            self.fc2 = init_linear_params(ks[3], 120, 84)
            self.fc3 = init_linear_params(ks[4], 84, 10)

    def __call__(self, x):
        # x: NCHW float32 (PyTorch convention at the boundary)
        if self.part == 'a':
            flat = x.reshape(x.shape[0], -1)            # NCHW flatten == torch .view
            w, b = self.a_fc
            return mlp(flat, [(w, b, False)])
        elif self.part == 'b':
            flat = x.reshape(x.shape[0], -1)
            (w1, b1), (w2, b2) = self.a_fc, self.h1_fc
            return mlp(flat, [(w1, b1, True), (w2, b2, False)])
        elif self.part == 'c':
            x_nhwc = jnp.transpose(x, (0, 2, 3, 1))
            w, b = self.convC
            feats = conv_relu_pool(x_nhwc, w, b, self.poolN)   # (B,Hp,Wp,C) bf16
            B, Hp, Wp, C = feats.shape
            flat = feats.reshape(B, -1)
            wf, bf = self.flat_fc
            wf = _nhwc_fc_weight(wf, C, Hp, Wp)
            return mlp(flat, [(wf, bf, False)])
        else:
            x_nhwc = jnp.transpose(x, (0, 2, 3, 1))
            (w1, b1), (w2, b2) = self.conv1, self.conv2
            feats = conv_relu_pool(x_nhwc, w1, b1, 2)          # bf16 activations
            feats = conv_relu_pool(feats, w2, b2, 2)
            B, Hp, Wp, C = feats.shape
            flat = feats.reshape(B, -1)
            (wf1, bf1), (wf2, bf2), (wf3, bf3) = self.fc1, self.fc2, self.fc3
            wf1 = _nhwc_fc_weight(wf1, C, Hp, Wp)
            return mlp(flat, [(wf1, bf1, True), (wf2, bf2, True), (wf3, bf3, False)])


# --------------------------------------------------------------------------
# References for validation of the default ('d') branch.
# --------------------------------------------------------------------------
def reference_forward_d_bf16(net, x):
    """Numerics-matched reference: bf16 matmul/conv operands, f32 accumulate."""
    f32 = jnp.float32

    def conv_bf16(x, w, b):
        y = jax.lax.conv_general_dilated(
            x.astype(jnp.bfloat16), w.astype(jnp.bfloat16),
            window_strides=(1, 1), padding='VALID',
            dimension_numbers=('NCHW', 'OIHW', 'NCHW'),
            preferred_element_type=f32)
        return y + b.reshape(1, -1, 1, 1).astype(f32)

    def pool2(x):
        return jax.lax.reduce_window(
            x, -jnp.inf, jax.lax.max, (1, 1, 2, 2), (1, 1, 2, 2), 'VALID')

    def lin_bf16(x, w, b):
        return jnp.dot(x.astype(jnp.bfloat16), w.T.astype(jnp.bfloat16),
                       preferred_element_type=f32) + b.astype(f32)

    (w1, b1), (w2, b2) = net.conv1, net.conv2
    h = pool2(jnp.maximum(conv_bf16(x, w1, b1), 0.0))
    h = pool2(jnp.maximum(conv_bf16(h, w2, b2), 0.0))
    h = h.reshape(h.shape[0], -1)
    (wf1, bf1), (wf2, bf2), (wf3, bf3) = net.fc1, net.fc2, net.fc3
    h = jnp.maximum(lin_bf16(h, wf1, bf1), 0.0)
    h = jnp.maximum(lin_bf16(h, wf2, bf2), 0.0)
    return lin_bf16(h, wf3, bf3)


def reference_forward_d_f32(net, x):
    """Full-f32 semantic reference (looser tolerance vs the bf16 kernel)."""
    def conv(x, w, b):
        y = jax.lax.conv_general_dilated(
            x, w, window_strides=(1, 1), padding='VALID',
            dimension_numbers=('NCHW', 'OIHW', 'NCHW'),
            precision=jax.lax.Precision.HIGHEST)
        return y + b.reshape(1, -1, 1, 1)

    def pool2(x):
        return jax.lax.reduce_window(
            x, -jnp.inf, jax.lax.max, (1, 1, 2, 2), (1, 1, 2, 2), 'VALID')

    (w1, b1), (w2, b2) = net.conv1, net.conv2
    h = pool2(jnp.maximum(conv(x, w1, b1), 0.0))
    h = pool2(jnp.maximum(conv(h, w2, b2), 0.0))
    h = h.reshape(h.shape[0], -1)
    (wf1, bf1), (wf2, bf2), (wf3, bf3) = net.fc1, net.fc2, net.fc3
    h = jnp.maximum(jnp.matmul(h, wf1.T, precision=jax.lax.Precision.HIGHEST) + bf1, 0.0)
    h = jnp.maximum(jnp.matmul(h, wf2.T, precision=jax.lax.Precision.HIGHEST) + bf2, 0.0)
    return jnp.matmul(h, wf3.T, precision=jax.lax.Precision.HIGHEST) + bf3


if __name__ == "__main__":
    key = jax.random.PRNGKey(0)
    k_x, k_params = jax.random.split(key)

    # CIFAR-like input implied by the module (32x32, 3 channels), batch=2.
    x = jax.random.normal(k_x, (2, IN_CHANNELS, 32, 32), jnp.float32)

    # Default ('else') branch: conv(3->6,5) -> pool2 -> conv(6->16,5) -> pool2
    # -> fc(400->120) -> fc(120->84) -> fc(84->10).  kernal_d=5 is the only
    # value consistent with the module's own fc1 dimensions.
    net = Net(part='d', out_channels=6, kernal_d=5, N=2, key=k_params)

    out = jax.block_until_ready(net(x))
    assert out.shape == (2, 10), out.shape

    # Tight check vs a numerics-matched (bf16-operand, f32-accumulate) reference.
    ref_bf16 = jax.block_until_ready(reference_forward_d_bf16(net, x))
    assert jnp.allclose(out, ref_bf16, rtol=2e-3, atol=2e-3), (
        float(jnp.max(jnp.abs(out - ref_bf16))))

    # Loose semantic check vs the pure-f32 reference.
    ref_f32 = jax.block_until_ready(reference_forward_d_f32(net, x))
    assert jnp.allclose(out, ref_f32, rtol=5e-2, atol=5e-2), (
        float(jnp.max(jnp.abs(out - ref_f32))))

    print("KERNEL_OK")
</pallas_src>

<mosaic_0001>
module attributes {stable_mosaic.version = 11 : i64} {
  func.func @kernel(%arg0: i32, %arg1: memref<4x208x75xbf16, #tpu.memory_space<vmem>>, %arg2: memref<75x128xbf16, #tpu.memory_space<vmem>>, %arg3: memref<1x128xf32, #tpu.memory_space<vmem>>, %arg4: memref<208x128xbf16, #tpu.memory_space<vmem>>) attributes {dimension_semantics = [#tpu.dimension_semantics<parallel>], iteration_bounds = array<i64: 2>, scalar_prefetch = 0 : i64, scratch_operands = 0 : i64, tpu.core_type = #tpu.core_type<tc>, window_params = [{transform_indices = @transform_0, window_bounds = array<i64: 4, 208, 75>}, {pipeline_mode = #tpu.pipeline_mode<synchronous>, transform_indices = @transform_1, window_bounds = array<i64: 75, 128>}, {pipeline_mode = #tpu.pipeline_mode<synchronous>, transform_indices = @transform_2, window_bounds = array<i64: 1, 128>}, {transform_indices = @transform_3, window_bounds = array<i64: 208, 128>}]} {
    %c0 = arith.constant 0 : index
    %c0_0 = arith.constant 0 : index
    %0 = vector.load %arg2[%c0, %c0_0] : memref<75x128xbf16, #tpu.memory_space<vmem>>, vector<75x128xbf16>
    %c0_1 = arith.constant 0 : index
    %c0_2 = arith.constant 0 : index
    %1 = vector.load %arg3[%c0_1, %c0_2] : memref<1x128xf32, #tpu.memory_space<vmem>>, vector<1x128xf32>
    %c0_3 = arith.constant 0 : index
    %c0_4 = arith.constant 0 : index
    %c0_5 = arith.constant 0 : index
    %2 = vector.load %arg1[%c0_3, %c0_4, %c0_5] : memref<4x208x75xbf16, #tpu.memory_space<vmem>>, vector<1x208x75xbf16>
    %3 = vector.shape_cast %2 : vector<1x208x75xbf16> to vector<208x75xbf16>
    %cst = arith.constant dense<0.000000e+00> : vector<208x128xf32>
    %4 = tpu.matmul %3, %0, %cst {dimension_numbers = #tpu.dot_dimension_numbers<[1], [0], [0], [1], [0, 0, 1, 1], [], []>} : vector<208x75xbf16>, vector<75x128xbf16>, vector<208x128xf32> -> vector<208x128xf32>
    %5 = vector.broadcast %1 : vector<1x128xf32> to vector<208x128xf32>
    %6 = arith.addf %4, %5 : vector<208x128xf32>
    %cst_6 = arith.constant 0.000000e+00 : f32
    %7 = vector.broadcast %cst_6 : f32 to vector<208x128xf32>
    %8 = arith.maximumf %6, %7 : vector<208x128xf32>
    %c1 = arith.constant 1 : index
    %c0_7 = arith.constant 0 : index
    %c0_8 = arith.constant 0 : index
    %9 = vector.load %arg1[%c1, %c0_7, %c0_8] : memref<4x208x75xbf16, #tpu.memory_space<vmem>>, vector<1x208x75xbf16>
    %10 = vector.shape_cast %9 : vector<1x208x75xbf16> to vector<208x75xbf16>
    %cst_9 = arith.constant dense<0.000000e+00> : vector<208x128xf32>
    %11 = tpu.matmul %10, %0, %cst_9 {dimension_numbers = #tpu.dot_dimension_numbers<[1], [0], [0], [1], [0, 0, 1, 1], [], []>} : vector<208x75xbf16>, vector<75x128xbf16>, vector<208x128xf32> -> vector<208x128xf32>
    %12 = vector.broadcast %1 : vector<1x128xf32> to vector<208x128xf32>
    %13 = arith.addf %11, %12 : vector<208x128xf32>
    %cst_10 = arith.constant 0.000000e+00 : f32
    %14 = vector.broadcast %cst_10 : f32 to vector<208x128xf32>
    %15 = arith.maximumf %13, %14 : vector<208x128xf32>
    %16 = arith.maximumf %8, %15 : vector<208x128xf32>
    %c2 = arith.constant 2 : index
    %c0_11 = arith.constant 0 : index
    %c0_12 = arith.constant 0 : index
    %17 = vector.load %arg1[%c2, %c0_11, %c0_12] : memref<4x208x75xbf16, #tpu.memory_space<vmem>>, vector<1x208x75xbf16>
    %18 = vector.shape_cast %17 : vector<1x208x75xbf16> to vector<208x75xbf16>
    %cst_13 = arith.constant dense<0.000000e+00> : vector<208x128xf32>
    %19 = tpu.matmul %18, %0, %cst_13 {dimension_numbers = #tpu.dot_dimension_numbers<[1], [0], [0], [1], [0, 0, 1, 1], [], []>} : vector<208x75xbf16>, vector<75x128xbf16>, vector<208x128xf32> -> vector<208x128xf32>
    %20 = vector.broadcast %1 : vector<1x128xf32> to vector<208x128xf32>
    %21 = arith.addf %19, %20 : vector<208x128xf32>
    %cst_14 = arith.constant 0.000000e+00 : f32
    %22 = vector.broadcast %cst_14 : f32 to vector<208x128xf32>
    %23 = arith.maximumf %21, %22 : vector<208x128xf32>
    %24 = arith.maximumf %16, %23 : vector<208x128xf32>
    %c3 = arith.constant 3 : index
    %c0_15 = arith.constant 0 : index
    %c0_16 = arith.constant 0 : index
    %25 = vector.load %arg1[%c3, %c0_15, %c0_16] : memref<4x208x75xbf16, #tpu.memory_space<vmem>>, vector<1x208x75xbf16>
    %26 = vector.shape_cast %25 : vector<1x208x75xbf16> to vector<208x75xbf16>
    %cst_17 = arith.constant dense<0.000000e+00> : vector<208x128xf32>
    %27 = tpu.matmul %26, %0, %cst_17 {dimension_numbers = #tpu.dot_dimension_numbers<[1], [0], [0], [1], [0, 0, 1, 1], [], []>} : vector<208x75xbf16>, vector<75x128xbf16>, vector<208x128xf32> -> vector<208x128xf32>
    %28 = vector.broadcast %1 : vector<1x128xf32> to vector<208x128xf32>
    %29 = arith.addf %27, %28 : vector<208x128xf32>
    %cst_18 = arith.constant 0.000000e+00 : f32
    %30 = vector.broadcast %cst_18 : f32 to vector<208x128xf32>
    %31 = arith.maximumf %29, %30 : vector<208x128xf32>
    %32 = arith.maximumf %24, %31 : vector<208x128xf32>
    %33 = arith.truncf %32 : vector<208x128xf32> to vector<208x128xbf16>
    %c0_19 = arith.constant 0 : index
    %c0_20 = arith.constant 0 : index
    %34 = vector.load %arg4[%c0_19, %c0_20] : memref<208x128xbf16, #tpu.memory_space<vmem>>, vector<208x128xbf16>
    tpu.vector_store %arg4[%c0_19, %c0_20], %33 {strides = array<i32>} : memref<208x128xbf16, #tpu.memory_space<vmem>>, vector<208x128xbf16>,
    return
  }
  func.func @transform_0(%arg0: i32) -> (i32, i32, i32) {
    %c0_i32 = arith.constant 0 : i32
    %c0_i32_0 = arith.constant 0 : i32
    %c0_i32_1 = arith.constant 0 : i32
    return %c0_i32, %arg0, %c0_i32_0 : i32, i32, i32
  }
  func.func @transform_1(%arg0: i32) -> (i32, i32) {
    %c0_i32 = arith.constant 0 : i32
    %c0_i32_0 = arith.constant 0 : i32
    %c0_i32_1 = arith.constant 0 : i32
    return %c0_i32, %c0_i32_0 : i32, i32
  }
  func.func @transform_2(%arg0: i32) -> (i32, i32) {
    %c0_i32 = arith.constant 0 : i32
    %c0_i32_0 = arith.constant 0 : i32
    %c0_i32_1 = arith.constant 0 : i32
    return %c0_i32, %c0_i32_0 : i32, i32
  }
  func.func @transform_3(%arg0: i32) -> (i32, i32) {
    %c0_i32 = arith.constant 0 : i32
    %c0_i32_0 = arith.constant 0 : i32
    return %arg0, %c0_i32 : i32, i32
  }
}

</mosaic_0001>

<bundles_post_ra>
// kernel: tpu_custom_call.1
= control target key start
LH: loop header
LB: loop body
LE: loop exit
PB: predicated region body
PF: predicated region fallthrough
CT: control target
= control target key end

     0   :  { %8 = vsyncpa [#allocation4], 0  ;;  %s2903_s0 = inlined_call_operand.vmem [shape: bf16[4,416,75], index: 0, kind: input, shape index: {}]   ;;  %s2904_s1 = inlined_call_operand.vmem [shape: bf16[75,128], index: 1, kind: input, shape index: {}]   ;;  %s2905_s2 = inlined_call_operand.vmem [shape: f32[1,128], index: 2, kind: input, shape index: {}]   ;;  %s2906_s3 = inlined_call_operand.hbm [shape: bf16[416,128], index: 3, kind: output, shape index: {}]  }
   0x1   :  { %10 = vsyncpa [#allocation4 + $0x1], 0  ;;  %s2451_s12 = smov 0   ;;  %s2453_s13 = smov 0  }
   0x2   :  { %s2455_s14 = smov 0   ;;  %s2457_s15 = smov 0  }
   0x3 LB: > { %s1815_s16 = sadd.s32 4294967295, %s2426_s15   ;;  %s1816_s17 = sadd.s32 4294967294, %s2426_s15   ;;  %s2426_s15 = sphi %s2457_s15, %s2912_s15   ;;  %s2422_s14 = sphi %s2455_s14, %s2911_s14   ;;  %s2418_s13 = sphi %s2453_s13, %s2910_s13   ;;  %s2414_s12 = sphi %s2451_s12, %s2909_s12  }
   0x4   : > { %s2474_s18 = sadd.s32 1, %s2426_s15   ;;  %s23_s19 = sadd.s32 1, %s2422_s14 }
   0x5   : > { %s20_s20 = ssub.s32 %s2426_s15, %s2474_s18  ;;  %p30_p0 = scmp.ne.s32.totalorder %s2422_s14, %s2418_s13 }
   0x6   : > { %p21_p1 = scmp.eq.s32.totalorder %s20_s20, 0  ;;  %p31_p2 = scmp.eq.s32.totalorder %s2426_s15, 0 }
   0x7   : > { %p102_p3 = scmp.eq.s32.totalorder %s1815_s16, 1  ;;  %p107_p4 = scmp.ne.s32.totalorder %s2418_s13, %s2414_s12 }
   0x8   : > { %s2487_s21 = scalar_select %p21_p1, %s2422_s14, %s23_s19  }
   0x9   : > { %p32_p5 = por %p31_p2, %p30_p0  ;;  %p2489_p6 = por %p102_p3, %p30_p0 }
   0xa   : > { %p108_p7 = scmp.eq.s32.totalorder %s1816_s17, 1  ;;  %p1818_p9 = scmp.ge.s32.totalorder %s2426_s15, 2 }
   0xc   : > { %p2493_p8 = por %p108_p7, %p107_p4  ;;  %130 = sbr.rel (%p1818_p9) target bundleno = 74 (0x4a), region = 24 }
  0x11   : > { %133 = sbr.rel (!%p32_p5) target bundleno = 74 (0x4a), region = 28  ;;  %s135_s24 = sand.u32 (%p32_p5), 1, %s2422_s14  }
  0x12   : > { %s2182_s25 = smul.u32 (%p32_p5), 104, %s2426_s15 }
  0x13   : > { %s2318_s26 = smul.u32 (%p32_p5), 416, %s135_s24 }
  0x14   : > { %s2505_s29 = scalar_lea.vmem (%p32_p5), %s2903_s0, %s2182_s25 }
  0x15   : > { %v157_v0 = vld [vmem:[%s2505_s29] sm:$0xff] (%p32_p5)   ;;  %v161_v1 = vld [vmem:[%s2505_s29 + $0x8] sm:$0xff] (%p32_p5)   ;;  %v165_v2 = vld [vmem:[%s2505_s29 + $0x10] sm:$0xff] (%p32_p5)   ;;  %s2510_s30 = scalar_lea.vmem (%p32_p5), [#allocation2], %s2318_s26 }
  0x16   : > { %158 = vst [vmem:[%s2510_s30] sm:$0xff] %v157_v0   ;;  %v169_v3 = vld [vmem:[%s2505_s29 + $0x18] sm:$0xff]   ;;  %v173_v4 = vld [vmem:[%s2505_s29 + $0x20] sm:$0xff]   ;;  %v177_v5 = vld [vmem:[%s2505_s29 + $0x28] sm:$0xff]  }
  0x17   : > { %162 = vst [vmem:[%s2510_s30 + $0x8] sm:$0xff] %v161_v1   ;;  %v181_v6 = vld [vmem:[%s2505_s29 + $0x30] sm:$0xff]   ;;  %v185_v7 = vld [vmem:[%s2505_s29 + $0x38] sm:$0xff]   ;;  %v189_v8 = vld [vmem:[%s2505_s29 + $0x40] sm:$0xff]  }
  0x18   : > { %166 = vst [vmem:[%s2510_s30 + $0x10] sm:$0xff] %v165_v2   ;;  %v193_v9 = vld [vmem:[%s2505_s29 + $0x48] sm:$0xff]   ;;  %v197_v10 = vld [vmem:[%s2505_s29 + $0x50] sm:$0xff]   ;;  %v201_v11 = vld [vmem:[%s2505_s29 + $0x58] sm:$0xff]  }
  0x19   : > { %170 = vst [vmem:[%s2510_s30 + $0x18] sm:$0xff] %v169_v3   ;;  %v205_v12 = vld [vmem:[%s2505_s29 + $0x60] sm:$0xff]   ;;  %v209_v13 = vld [vmem:[%s2505_s29 + $0xd0] sm:$0xff]   ;;  %v213_v14 = vld [vmem:[%s2505_s29 + $0xd8] sm:$0xff]  }
  0x1a   : > { %174 = vst [vmem:[%s2510_s30 + $0x20] sm:$0xff] %v173_v4   ;;  %v217_v15 = vld [vmem:[%s2505_s29 + $0xe0] sm:$0xff]   ;;  %v221_v16 = vld [vmem:[%s2505_s29 + $0xe8] sm:$0xff]   ;;  %v225_v17 = vld [vmem:[%s2505_s29 + $0xf0] sm:$0xff]  }
  0x1b   : > { %178 = vst [vmem:[%s2510_s30 + $0x28] sm:$0xff] %v177_v5   ;;  %v229_v18 = vld [vmem:[%s2505_s29 + $0xf8] sm:$0xff]   ;;  %v233_v19 = vld [vmem:[%s2505_s29 + $0x100] sm:$0xff]   ;;  %v237_v20 = vld [vmem:[%s2505_s29 + $0x108] sm:$0xff]  }
  0x1c   : > { %182 = vst [vmem:[%s2510_s30 + $0x30] sm:$0xff] %v181_v6   ;;  %v241_v21 = vld [vmem:[%s2505_s29 + $0x110] sm:$0xff]   ;;  %v245_v22 = vld [vmem:[%s2505_s29 + $0x118] sm:$0xff]   ;;  %v249_v23 = vld [vmem:[%s2505_s29 + $0x120] sm:$0xff]  }
  0x1d   : > { %186 = vst [vmem:[%s2510_s30 + $0x38] sm:$0xff] %v185_v7   ;;  %v253_v24 = vld [vmem:[%s2505_s29 + $0x128] sm:$0xff]   ;;  %v257_v25 = vld [vmem:[%s2505_s29 + $0x130] sm:$0xff]   ;;  %v261_v26 = vld [vmem:[%s2505_s29 + $0x1a0] sm:$0xff]  }
  0x1e   : > { %190 = vst [vmem:[%s2510_s30 + $0x40] sm:$0xff] %v189_v8   ;;  %v265_v27 = vld [vmem:[%s2505_s29 + $0x1a8] sm:$0xff]   ;;  %v269_v28 = vld [vmem:[%s2505_s29 + $0x1b0] sm:$0xff]   ;;  %v273_v29 = vld [vmem:[%s2505_s29 + $0x1b8] sm:$0xff]  }
  0x1f   : > { %194 = vst [vmem:[%s2510_s30 + $0x48] sm:$0xff] %v193_v9   ;;  %v277_v30 = vld [vmem:[%s2505_s29 + $0x1c0] sm:$0xff]   ;;  %v281_v31 = vld [vmem:[%s2505_s29 + $0x1c8] sm:$0xff]   ;;  %v285_v32 = vld [vmem:[%s2505_s29 + $0x1d0] sm:$0xff]  }
  0x20   : > { %198 = vst [vmem:[%s2510_s30 + $0x50] sm:$0xff] %v197_v10   ;;  %v289_v33 = vld [vmem:[%s2505_s29 + $0x1d8] sm:$0xff]   ;;  %v293_v34 = vld [vmem:[%s2505_s29 + $0x1e0] sm:$0xff]   ;;  %v297_v35 = vld [vmem:[%s2505_s29 + $0x1e8] sm:$0xff]  }
  0x21   : > { %202 = vst [vmem:[%s2510_s30 + $0x58] sm:$0xff] %v201_v11   ;;  %v301_v36 = vld [vmem:[%s2505_s29 + $0x1f0] sm:$0xff]   ;;  %v305_v37 = vld [vmem:[%s2505_s29 + $0x1f8] sm:$0xff]   ;;  %v309_v38 = vld [vmem:[%s2505_s29 + $0x200] sm:$0xff]  }
  0x22   : > { %206 = vst [vmem:[%s2510_s30 + $0x60] sm:$0xff] %v205_v12   ;;  %v313_v39 = vld [vmem:[%s2505_s29 + $0x270] sm:$0xff]   ;;  %v317_v40 = vld [vmem:[%s2505_s29 + $0x278] sm:$0xff]   ;;  %v321_v41 = vld [vmem:[%s2505_s29 + $0x280] sm:$0xff]  }
  0x23   : > { %210 = vst [vmem:[%s2510_s30 + $0x68] sm:$0xff] %v209_v13   ;;  %v325_v42 = vld [vmem:[%s2505_s29 + $0x288] sm:$0xff]   ;;  %v329_v43 = vld [vmem:[%s2505_s29 + $0x290] sm:$0xff]   ;;  %v333_v44 = vld [vmem:[%s2505_s29 + $0x298] sm:$0xff]  }
  0x24   : > { %214 = vst [vmem:[%s2510_s30 + $0x70] sm:$0xff] %v213_v14   ;;  %v337_v45 = vld [vmem:[%s2505_s29 + $0x2a0] sm:$0xff]   ;;  %v341_v46 = vld [vmem:[%s2505_s29 + $0x2a8] sm:$0xff]   ;;  %v345_v47 = vld [vmem:[%s2505_s29 + $0x2b0] sm:$0xff]  }
  0x25   : > { %218 = vst [vmem:[%s2510_s30 + $0x78] sm:$0xff] %v217_v15   ;;  %v349_v48 = vld [vmem:[%s2505_s29 + $0x2b8] sm:$0xff]   ;;  %v353_v49 = vld [vmem:[%s2505_s29 + $0x2c0] sm:$0xff]   ;;  %v357_v50 = vld [vmem:[%s2505_s29 + $0x2c8] sm:$0xff]  }
  0x26   : > { %222 = vst [vmem:[%s2510_s30 + $0x80] sm:$0xff] %v221_v16   ;;  %v361_v51 = vld [vmem:[%s2505_s29 + $0x2d0] sm:$0xff]  }
  0x27   : > { %226 = vst [vmem:[%s2510_s30 + $0x88] sm:$0xff] %v225_v17  }
  0x28   : > { %230 = vst [vmem:[%s2510_s30 + $0x90] sm:$0xff] %v229_v18  }
  0x29   : > { %234 = vst [vmem:[%s2510_s30 + $0x98] sm:$0xff] %v233_v19  }
  0x2a   : > { %238 = vst [vmem:[%s2510_s30 + $0xa0] sm:$0xff] %v237_v20  }
  0x2b   : > { %242 = vst [vmem:[%s2510_s30 + $0xa8] sm:$0xff] %v241_v21  }
  0x2c   : > { %246 = vst [vmem:[%s2510_s30 + $0xb0] sm:$0xff] %v245_v22  }
  0x2d   : > { %250 = vst [vmem:[%s2510_s30 + $0xb8] sm:$0xff] %v249_v23  }
  0x2e   : > { %254 = vst [vmem:[%s2510_s30 + $0xc0] sm:$0xff] %v253_v24  }
  0x2f   : > { %258 = vst [vmem:[%s2510_s30 + $0xc8] sm:$0xff] %v257_v25  }
  0x30   : > { %262 = vst [vmem:[%s2510_s30 + $0xd0] sm:$0xff] %v261_v26  }
  0x31   : > { %266 = vst [vmem:[%s2510_s30 + $0xd8] sm:$0xff] %v265_v27  }
  0x32   : > { %270 = vst [vmem:[%s2510_s30 + $0xe0] sm:$0xff] %v269_v28  }
  0x33   : > { %274 = vst [vmem:[%s2510_s30 + $0xe8] sm:$0xff] %v273_v29  }
  0x34   : > { %278 = vst [vmem:[%s2510_s30 + $0xf0] sm:$0xff] %v277_v30  }
  0x35   : > { %282 = vst [vmem:[%s2510_s30 + $0xf8] sm:$0xff] %v281_v31  }
  0x36   : > { %286 = vst [vmem:[%s2510_s30 + $0x100] sm:$0xff] %v285_v32  }
  0x37   : > { %290 = vst [vmem:[%s2510_s30 + $0x108] sm:$0xff] %v289_v33  }
  0x38   : > { %294 = vst [vmem:[%s2510_s30 + $0x110] sm:$0xff] %v293_v34  }
  0x39   : > { %298 = vst [vmem:[%s2510_s30 + $0x118] sm:$0xff] %v297_v35  }
  0x3a   : > { %302 = vst [vmem:[%s2510_s30 + $0x120] sm:$0xff] %v301_v36  }
  0x3b   : > { %306 = vst [vmem:[%s2510_s30 + $0x128] sm:$0xff] %v305_v37  }
  0x3c   : > { %310 = vst [vmem:[%s2510_s30 + $0x130] sm:$0xff] %v309_v38  }
  0x3d   : > { %314 = vst [vmem:[%s2510_s30 + $0x138] sm:$0xff] %v313_v39  }
  0x3e   : > { %318 = vst [vmem:[%s2510_s30 + $0x140] sm:$0xff] %v317_v40  }
  0x3f   : > { %322 = vst [vmem:[%s2510_s30 + $0x148] sm:$0xff] %v321_v41  }
  0x40   : > { %326 = vst [vmem:[%s2510_s30 + $0x150] sm:$0xff] %v325_v42  }
  0x41   : > { %330 = vst [vmem:[%s2510_s30 + $0x158] sm:$0xff] %v329_v43  }
  0x42   : > { %334 = vst [vmem:[%s2510_s30 + $0x160] sm:$0xff] %v333_v44  }
  0x43   : > { %338 = vst [vmem:[%s2510_s30 + $0x168] sm:$0xff] %v337_v45  }
  0x44   : > { %342 = vst [vmem:[%s2510_s30 + $0x170] sm:$0xff] %v341_v46  }
  0x45   : > { %346 = vst [vmem:[%s2510_s30 + $0x178] sm:$0xff] %v345_v47  }
  0x46   : > { %350 = vst [vmem:[%s2510_s30 + $0x180] sm:$0xff] %v349_v48  }
  0x47   : > { %354 = vst [vmem:[%s2510_s30 + $0x188] sm:$0xff] %v353_v49  }
  0x48   : > { %358 = vst [vmem:[%s2510_s30 + $0x190] sm:$0xff] %v357_v50  }
  0x49   : > { %362 = vst [vmem:[%s2510_s30 + $0x198] sm:$0xff] %v361_v51  }
  0x4a PF: > { %p1820_p10 = scmp.ge.s32.totalorder %s2426_s15, 1  ;;  %p595_p11 = scmp.lt.s32.totalorder %s2426_s15, 3 }
  0x4c   : > { %p596_p12 = pnand %p1820_p10, %p595_p11 }
  0x4d   : > { %s2628_s17 = sand.u32 (!%p596_p12), 1, %s2418_s13   ;;  %s2240_s5 = smul.u32 (!%p596_p12), 104, %s1815_s16 }
  0x4e   : > { %599 = sbr.rel (%p596_p12) target bundleno = 455 (0x1c7), region = 69  ;;  %s1733_s10 = scalar_lea.sflag (!%p596_p12), [#allocation4], %s2628_s17 }
  0x4f   : > { %s2319_s24 = smul.u32 (!%p596_p12), 416, %s2628_s17  ;;  %s1744_s8 = scalar_lea.hbm (!%p596_p12), %s2906_s3, %s2240_s5 }
  0x50   : > { %s2320_s30 = smul.u32 (!%p596_p12), 104, %s2628_s17  ;;  %s1747_s9 = sshll.u32 (!%p596_p12), %s1744_s8, 4  ;;  %s1748_s9 = int_to_ptr.hbm [resolvable:$true] %s1747_s9 }
  0x51   : > { %s2637_s27 = scalar_lea.vmem (!%p596_p12), [#allocation2], %s2319_s24  ;;  %s2378_s11 = sshra.s32 (!%p596_p12), %s1748_s9, 4  ;;  %s2379_s11 = int_to_ptr.hbm [resolvable:$true] %s2378_s11 }
  0x52   : > { %s2735_s4 = scalar_lea.vmem (!%p596_p12), [#allocation3], %s2320_s30  ;;  %s2380_s19 = scalar_lea.hbm (!%p596_p12), %s2379_s11, 104 }
  0x53   : > { %v1891_v52 = vld [vmem:[%s2904_s1 + $0x20] sm:$0xf]  ;;  %v2187_v53 = vld [vmem:[%s2904_s1 + $0x20] sm:$0x30]  ;;  %vm802_vm0 = vcmask 1044480   ;;  %vm803_vm1 = vcmask 1045504   ;;  %p2381_p13 = scmp.ne.s32.totalorder %s2379_s11, %s2380_s19  ;;  %p2385_p2 = scmp.lt.s32.totalorder %s2379_s11, %s2906_s3 }
  0x54   : > { %v1892_v54 = vor.u32 %v2187_v53, %v1891_v52  ;;  %v2428_v55 = vmov 65535   ;;  %v2186_v59 = vld [vmem:[%s2904_s1 + $0x18] sm:$0xff]  ;;  %v2185_v60 = vld [vmem:[%s2904_s1 + $0x10] sm:$0xff]  ;;  %v2184_v61 = vld [vmem:[%s2904_s1 + $0x8] sm:$0xff]  ;;  %vm762_vm2 = vcmask 613376   ;;  %s1745_s16 = sshll.u32 %s2735_s4, 4  ;;  %s1746_s16 = int_to_ptr.vmem [resolvable:$true] %s1745_s16 }
  0x55   : > { %v804_v56 = vsel %vm802_vm0, 4294967295, %v2428_v55  ;;  %v2183_v62 = vld [vmem:[%s2904_s1] sm:$0xff]  ;;  %v2201_v0 = vld [vmem:[%s2637_s27 + $0x68] sm:$0xff]  ;;  %v2214_v1 = vld [vmem:[%s2637_s27 + $0xd0] sm:$0xff]  ;;  %p2382_p0 = pnand %p2381_p13, %p2489_p6  ;;  %s2384_s25 = scalar_lea.hbm %s2906_s3, 208 }
  0x56   : > { %v805_v57 = vsel %vm803_vm1, %v804_v56, 0  ;;  %v2188_v63 = vld [vmem:[%s2637_s27] sm:$0xff]  ;;  %v2227_v2 = vld [vmem:[%s2637_s27 + $0x138] sm:$0xff]  ;;  %v2189_v3 = vld [vmem:[%s2637_s27 + $0x8] sm:$0xff]  ;;  %p2386_p3 = scmp.lt.s32.totalorder %s2384_s25, %s2380_s19 }
  0x57   : > { %v807_v58 = vand.u32 %v1892_v54, %v805_v57  ;;  %v2202_v4 = vld [vmem:[%s2637_s27 + $0x70] sm:$0xff]  ;;  %v2215_v5 = vld [vmem:[%s2637_s27 + $0xd8] sm:$0xff]  ;;  %v2228_v6 = vld [vmem:[%s2637_s27 + $0x140] sm:$0xff]  ;;  %p2383_p1 = pneg %p2382_p0 }
  0x58   : > { %v2190_v7 = vld [vmem:[%s2637_s27 + $0x10] sm:$0xff]  ;;  %v2203_v8 = vld [vmem:[%s2637_s27 + $0x78] sm:$0xff]  ;;  %v2216_v9 = vld [vmem:[%s2637_s27 + $0xe0] sm:$0xff]  ;;  %p2387_p4 = por %p2386_p3, %p2385_p2 }
  0x59   : > { %812 = vmatpush.bf16.msra.mxu0 %v807_v58  ;;  %1043 = vmatpush.bf16.msra.mxu1 %v807_v58  ;;  %v2229_v10 = vld [vmem:[%s2637_s27 + $0x148] sm:$0xff]  ;;  %v2191_v11 = vld [vmem:[%s2637_s27 + $0x18] sm:$0xff]  ;;  %v2204_v12 = vld [vmem:[%s2637_s27 + $0x80] sm:$0xff] }
  0x5a   : > { %1300 = vmatpush.bf16.msra.mxu2 %v807_v58  ;;  %1557 = vmatpush.bf16.msra.mxu3 %v807_v58  ;;  %v2217_v13 = vld [vmem:[%s2637_s27 + $0xe8] sm:$0xff]  ;;  %v2230_v14 = vld [vmem:[%s2637_s27 + $0x150] sm:$0xff]  ;;  %v2192_v15 = vld [vmem:[%s2637_s27 + $0x20] sm:$0xff]  ;;  %p2388_p5 = pnand %p2387_p4, %p2383_p1 }
  0x5b   : > { %v2205_v16 = vld [vmem:[%s2637_s27 + $0x88] sm:$0xff]  ;;  %v2218_v17 = vld [vmem:[%s2637_s27 + $0xf0] sm:$0xff]  ;;  %v2231_v18 = vld [vmem:[%s2637_s27 + $0x158] sm:$0xff] }
  0x5c   : > { %v2193_v19 = vld [vmem:[%s2637_s27 + $0x28] sm:$0xff]  ;;  %v2206_v20 = vld [vmem:[%s2637_s27 + $0x90] sm:$0xff]  ;;  %v2219_v21 = vld [vmem:[%s2637_s27 + $0xf8] sm:$0xff] }
  0x5d   : > { %813 = vmatpush.bf16.msra.mxu0 %v2186_v59  ;;  %1044 = vmatpush.bf16.msra.mxu1 %v2186_v59  ;;  %v2232_v22 = vld [vmem:[%s2637_s27 + $0x160] sm:$0xff]  ;;  %v2194_v23 = vld [vmem:[%s2637_s27 + $0x30] sm:$0xff]  ;;  %v2207_v24 = vld [vmem:[%s2637_s27 + $0x98] sm:$0xff] }
  0x5e   : > { %1301 = vmatpush.bf16.msra.mxu2 %v2186_v59  ;;  %1558 = vmatpush.bf16.msra.mxu3 %v2186_v59  ;;  %v2220_v25 = vld [vmem:[%s2637_s27 + $0x100] sm:$0xff]  ;;  %v2233_v26 = vld [vmem:[%s2637_s27 + $0x168] sm:$0xff]  ;;  %v2195_v27 = vld [vmem:[%s2637_s27 + $0x38] sm:$0xff] }
  0x5f   : > { %v2208_v28 = vld [vmem:[%s2637_s27 + $0xa0] sm:$0xff]  ;;  %v2221_v29 = vld [vmem:[%s2637_s27 + $0x108] sm:$0xff]  ;;  %v2234_v30 = vld [vmem:[%s2637_s27 + $0x170] sm:$0xff] }
  0x60   : > { %v2196_v31 = vld [vmem:[%s2637_s27 + $0x40] sm:$0xff]  ;;  %v2209_v32 = vld [vmem:[%s2637_s27 + $0xa8] sm:$0xff]  ;;  %v2222_v35 = vld [vmem:[%s2637_s27 + $0x110] sm:$0xff] }
  0x61   : > { %814 = vmatpush.bf16.msra.mxu0 %v2185_v60  ;;  %1045 = vmatpush.bf16.msra.mxu1 %v2185_v60  ;;  %v2235_v36 = vld [vmem:[%s2637_s27 + $0x178] sm:$0xff]  ;;  %v2710_v37 = vld [vmem:[%s2905_s2] ss:$0 sm:$0xff]  ;;  %v2197_v56 = vld [vmem:[%s2637_s27 + $0x48] sm:$0xff] }
  0x62   : > { %1302 = vmatpush.bf16.msra.mxu2 %v2185_v60  ;;  %1559 = vmatpush.bf16.msra.mxu3 %v2185_v60  ;;  %v2210_v57 = vld [vmem:[%s2637_s27 + $0xb0] sm:$0xff] }
  0x65   : > { %815 = vmatpush.bf16.msra.mxu0 %v2184_v61  ;;  %1046 = vmatpush.bf16.msra.mxu1 %v2184_v61 }
  0x66   : > { %1303 = vmatpush.bf16.msra.mxu2 %v2184_v61  ;;  %1560 = vmatpush.bf16.msra.mxu3 %v2184_v61 }
  0x69   : > { %816 = vmatpush.bf16.msra.mxu0 %v2183_v62  ;;  %1047 = vmatpush.bf16.msra.mxu1 %v2183_v62 }
  0x6a   : > { %1304 = vmatpush.bf16.msra.mxu2 %v2183_v62  ;;  %1561 = vmatpush.bf16.msra.mxu3 %v2183_v62  ;;  %v2223_v62 = vld [vmem:[%s2637_s27 + $0x118] sm:$0xff] }
  0x6c   : > { %1893 = vmatmul.msk.bf16.vlgmr.msra.gmra.mxu0 %vm762_vm2, %v2188_v63  ;;  %1984 = vmatmul.msk.bf16.vlgmr.msra.gmra.mxu1 %vm762_vm2, %v2201_v0  ;;  %v2236_v63 = vld [vmem:[%s2637_s27 + $0x180] sm:$0xff] }
  0x6d   : > { %2075 = vmatmul.msk.bf16.vlgmr.msra.gmra.mxu2 %vm762_vm2, %v2214_v1  ;;  %2166 = vmatmul.msk.bf16.vlgmr.msra.gmra.mxu3 %vm762_vm2, %v2227_v2 }
  0x7c   : > { %1894 = vmatmul.msk.bf16.gmra.mxu0 %vm762_vm2, %v2189_v3  ;;  %1985 = vmatmul.msk.bf16.gmra.mxu1 %vm762_vm2, %v2202_v4 }
  0x7d   : > { %2076 = vmatmul.msk.bf16.gmra.mxu2 %vm762_vm2, %v2215_v5  ;;  %2167 = vmatmul.msk.bf16.gmra.mxu3 %vm762_vm2, %v2228_v6 }
  0x8c   : > { %1895 = vmatmul.msk.bf16.gmra.mxu0 %vm762_vm2, %v2190_v7  ;;  %1986 = vmatmul.msk.bf16.gmra.mxu1 %vm762_vm2, %v2203_v8 }
  0x8d   : > { %2077 = vmatmul.msk.bf16.gmra.mxu2 %vm762_vm2, %v2216_v9  ;;  %2168 = vmatmul.msk.bf16.gmra.mxu3 %vm762_vm2, %v2229_v10 }
  0x9c   : > { %1896 = vmatmul.msk.bf16.gmra.mxu0 %vm762_vm2, %v2191_v11  ;;  %1987 = vmatmul.msk.bf16.gmra.mxu1 %vm762_vm2, %v2204_v12 }
  0x9d   : > { %2078 = vmatmul.msk.bf16.gmra.mxu2 %vm762_vm2, %v2217_v13  ;;  %2169 = vmatmul.msk.bf16.gmra.mxu3 %vm762_vm2, %v2230_v14 }
  0xac   : > { %1897 = vmatmul.msk.bf16.gmra.mxu0 %vm762_vm2, %v2192_v15  ;;  %1988 = vmatmul.msk.bf16.gmra.mxu1 %vm762_vm2, %v2205_v16 }
  0xad   : > { %2079 = vmatmul.msk.bf16.gmra.mxu2 %vm762_vm2, %v2218_v17  ;;  %2170 = vmatmul.msk.bf16.gmra.mxu3 %vm762_vm2, %v2231_v18 }
  0xbc   : > { %1898 = vmatmul.msk.bf16.gmra.mxu0 %vm762_vm2, %v2193_v19  ;;  %1989 = vmatmul.msk.bf16.gmra.mxu1 %vm762_vm2, %v2206_v20 }
  0xbd   : > { %2080 = vmatmul.msk.bf16.gmra.mxu2 %vm762_vm2, %v2219_v21  ;;  %2171 = vmatmul.msk.bf16.gmra.mxu3 %vm762_vm2, %v2232_v22 }
  0xcc   : > { %1899 = vmatmul.msk.bf16.gmra.mxu0 %vm762_vm2, %v2194_v23  ;;  %1990 = vmatmul.msk.bf16.gmra.mxu1 %vm762_vm2, %v2207_v24 }
  0xcd   : > { %2081 = vmatmul.msk.bf16.gmra.mxu2 %vm762_vm2, %v2220_v25  ;;  %2172 = vmatmul.msk.bf16.gmra.mxu3 %vm762_vm2, %v2233_v26 }
  0xdc   : > { %1900 = vmatmul.msk.bf16.gmra.mxu0 %vm762_vm2, %v2195_v27  ;;  %1991 = vmatmul.msk.bf16.gmra.mxu1 %vm762_vm2, %v2208_v28  ;;  %v2198_v27 = vld [vmem:[%s2637_s27 + $0x50] sm:$0xff]  ;;  %v2211_v28 = vld [vmem:[%s2637_s27 + $0xb8] sm:$0xff] }
  0xdd   : > { %2082 = vmatmul.msk.bf16.gmra.mxu2 %vm762_vm2, %v2221_v29  ;;  %2173 = vmatmul.msk.bf16.gmra.mxu3 %vm762_vm2, %v2234_v30 }
  0xe9   : > { %v818_v33 = vpop.f32.mrf.mxu0  ;;  %v1049_v34 = vpop.f32.mrf.mxu1 }
  0xea   : > { %v819_v38 = vadd.f32 %v2710_v37, %v818_v33  ;;  %v1050_v39 = vadd.f32 %v2710_v37, %v1049_v34  ;;  %v2224_v33 = vld [vmem:[%s2637_s27 + $0x120] sm:$0xff]  ;;  %v2237_v34 = vld [vmem:[%s2637_s27 + $0x188] sm:$0xff] }
  0xec   : > { %1901 = vmatmul.msk.bf16.gmra.mxu0 %vm762_vm2, %v2196_v31  ;;  %1992 = vmatmul.msk.bf16.gmra.mxu1 %vm762_vm2, %v2209_v32  ;;  %v883_v44 = vmax.f32 %v819_v38, 0.0  ;;  %v1114_v45 = vmax.f32 %v1050_v39, 0.0 }
  0xed   : > { %2083 = vmatmul.msk.bf16.gmra.mxu2 %vm762_vm2, %v2222_v35  ;;  %2174 = vmatmul.msk.bf16.gmra.mxu3 %vm762_vm2, %v2235_v36 }
  0xee   : > { %v1140_v49 = vmax.f32 %v883_v44, %v1114_v45 }
  0xf0   : > { %v1306_v40 = vpop.f32.mrf.mxu2  ;;  %v1563_v41 = vpop.f32.mrf.mxu3 }
  0xf1   : > { %v820_v42 = vpop.f32.mrf.mxu0  ;;  %v1051_v43 = vpop.f32.mrf.mxu1  ;;  %v1307_v46 = vadd.f32 %v2710_v37, %v1306_v40  ;;  %v1564_v51 = vadd.f32 %v2710_v37, %v1563_v41 }
  0xf2   : > { %v821_v47 = vadd.f32 %v2710_v37, %v820_v42  ;;  %v1052_v48 = vadd.f32 %v2710_v37, %v1051_v43 }
  0xf3   : > { %v1371_v50 = vmax.f32 %v1307_v46, 0.0  ;;  %v1628_v1 = vmax.f32 %v1564_v51, 0.0 }
  0xf4   : > { %v884_v52 = vmax.f32 %v821_v47, 0.0  ;;  %v1115_v53 = vmax.f32 %v1052_v48, 0.0 }
  0xf5   : > { %v1397_v0 = vmax.f32 %v1140_v49, %v1371_v50 }
  0xf6   : > { %v1141_v2 = vmax.f32 %v884_v52, %v1115_v53 }
  0xf7   : > { %v1654_v8 = vmax.f32 %v1397_v0, %v1628_v1  ;;  %v2212_v0 = vld [vmem:[%s2637_s27 + $0xc0] sm:$0xff] }
  0xf8   : > { %v1308_v54 = vpop.f32.mrf.mxu2  ;;  %v1565_v55 = vpop.f32.mrf.mxu3 }
  0xf9   : > { %v1309_v58 = vadd.f32 %v2710_v37, %v1308_v54  ;;  %v1566_v59 = vadd.f32 %v2710_v37, %v1565_v55  ;;  %v823_v60 = vpop.f32.mrf.mxu0  ;;  %v1054_v61 = vpop.f32.mrf.mxu1 }
  0xfa   : > { %v824_v6 = vadd.f32 %v2710_v37, %v823_v60  ;;  %v1055_v7 = vadd.f32 %v2710_v37, %v1054_v61 }
  0xfb   : > { %v1372_v3 = vmax.f32 %v1309_v58, 0.0  ;;  %v1629_v5 = vmax.f32 %v1566_v59, 0.0 }
  0xfc   : > { %1902 = vmatmul.msk.bf16.gmra.mxu0 %vm762_vm2, %v2197_v56  ;;  %1993 = vmatmul.msk.bf16.gmra.mxu1 %vm762_vm2, %v2210_v57  ;;  %v885_v15 = vmax.f32 %v824_v6, 0.0  ;;  %v1116_v16 = vmax.f32 %v1055_v7, 0.0  ;;  %v2238_v6 = vld [vmem:[%s2637_s27 + $0x190] sm:$0xff] }
  0xfd   : > { %v1398_v4 = vmax.f32 %v1141_v2, %v1372_v3  ;;  %2084 = vmatmul.msk.bf16.gmra.mxu2 %vm762_vm2, %v2223_v62  ;;  %2175 = vmatmul.msk.bf16.gmra.mxu3 %vm762_vm2, %v2236_v63  ;;  %v2199_v63 = vld [vmem:[%s2637_s27 + $0x58] sm:$0xff] }
  0xfe   : > { %v1142_v20 = vmax.f32 %v885_v15, %v1116_v16 }
  0xff   : > { %v1655_v9 = vmax.f32 %v1398_v4, %v1629_v5  ;;  %v2225_v5 = vld [vmem:[%s2637_s27 + $0x128] sm:$0xff] }
 0x100   : > { %v1311_v10 = vpop.f32.mrf.mxu2  ;;  %v1568_v11 = vpop.f32.mrf.mxu3 }
 0x101   : > { %v2244_v12 = vpack.c.bf16 %v1655_v9, %v1654_v8  ;;  %v825_v13 = vpop.f32.mrf.mxu0  ;;  %v1056_v14 = vpop.f32.mrf.mxu1  ;;  %v1312_v17 = vadd.f32 %v2710_v37, %v1311_v10  ;;  %v1569_v22 = vadd.f32 %v2710_v37, %v1568_v11 }
 0x102   : > { %v826_v18 = vadd.f32 %v2710_v37, %v825_v13  ;;  %v1057_v19 = vadd.f32 %v2710_v37, %v1056_v14 }
 0x103   : > { %2245 = vst [vmem:[%s2735_s4] sm:$0xff] %v2244_v12   ;;  %v1373_v21 = vmax.f32 %v1312_v17, 0.0  ;;  %v1630_v36 = vmax.f32 %v1569_v22, 0.0 }
 0x104   : > { %v886_v23 = vmax.f32 %v826_v18, 0.0  ;;  %v1117_v24 = vmax.f32 %v1057_v19, 0.0 }
 0x105   : > { %v1399_v35 = vmax.f32 %v1142_v20, %v1373_v21 }
 0x106   : > { %v1143_v38 = vmax.f32 %v886_v23, %v1117_v24 }
 0x107   : > { %v1656_v44 = vmax.f32 %v1399_v35, %v1630_v36  ;;  %v2213_v35 = vld [vmem:[%s2637_s27 + $0xc8] sm:$0xff] }
 0x108   : > { %v1313_v25 = vpop.f32.mrf.mxu2  ;;  %v1570_v26 = vpop.f32.mrf.mxu3 }
 0x109   : > { %v1314_v29 = vadd.f32 %v2710_v37, %v1313_v25  ;;  %v1571_v30 = vadd.f32 %v2710_v37, %v1570_v26  ;;  %v828_v31 = vpop.f32.mrf.mxu0  ;;  %v1059_v32 = vpop.f32.mrf.mxu1 }
 0x10a   : > { %v829_v42 = vadd.f32 %v2710_v37, %v828_v31  ;;  %v1060_v43 = vadd.f32 %v2710_v37, %v1059_v32 }
 0x10b   : > { %v1374_v39 = vmax.f32 %v1314_v29, 0.0  ;;  %v1631_v41 = vmax.f32 %v1571_v30, 0.0 }
 0x10c   : > { %1903 = vmatmul.msk.bf16.gmra.mxu0 %vm762_vm2, %v2198_v27  ;;  %1994 = vmatmul.msk.bf16.gmra.mxu1 %vm762_vm2, %v2211_v28  ;;  %v887_v51 = vmax.f32 %v829_v42, 0.0  ;;  %v1118_v52 = vmax.f32 %v1060_v43, 0.0  ;;  %v2239_v42 = vld [vmem:[%s2637_s27 + $0x198] sm:$0xff] }
 0x10d   : > { %v1400_v40 = vmax.f32 %v1143_v38, %v1374_v39  ;;  %2085 = vmatmul.msk.bf16.gmra.mxu2 %vm762_vm2, %v2224_v33  ;;  %2176 = vmatmul.msk.bf16.gmra.mxu3 %vm762_vm2, %v2237_v34  ;;  %v2200_v34 = vld [vmem:[%s2637_s27 + $0x60] sm:$0xff] }
 0x10e   : > { %v1144_v56 = vmax.f32 %v887_v51, %v1118_v52 }
 0x10f   : > { %v1657_v45 = vmax.f32 %v1400_v40, %v1631_v41  ;;  %v2226_v41 = vld [vmem:[%s2637_s27 + $0x130] sm:$0xff] }
 0x110   : > { %v1316_v46 = vpop.f32.mrf.mxu2  ;;  %v1573_v47 = vpop.f32.mrf.mxu3 }
 0x111   : > { %v2249_v48 = vpack.c.bf16 %v1657_v45, %v1656_v44  ;;  %v830_v49 = vpop.f32.mrf.mxu0  ;;  %v1061_v50 = vpop.f32.mrf.mxu1  ;;  %v1317_v53 = vadd.f32 %v2710_v37, %v1316_v46  ;;  %v1574_v58 = vadd.f32 %v2710_v37, %v1573_v47 }
 0x112   : > { %v831_v54 = vadd.f32 %v2710_v37, %v830_v49  ;;  %v1062_v55 = vadd.f32 %v2710_v37, %v1061_v50 }
 0x113   : > { %2306 = vst [vmem:[%s2735_s4 + $0x8] sm:$0xff] %v2249_v48   ;;  %v1375_v57 = vmax.f32 %v1317_v53, 0.0  ;;  %v1632_v8 = vmax.f32 %v1574_v58, 0.0 }
 0x114   : > { %v888_v59 = vmax.f32 %v831_v54, 0.0  ;;  %v1119_v60 = vmax.f32 %v1062_v55, 0.0 }
 0x115   : > { %v1401_v7 = vmax.f32 %v1144_v56, %v1375_v57 }
 0x116   : > { %v1145_v9 = vmax.f32 %v888_v59, %v1119_v60 }
 0x117   : > { %v1658_v15 = vmax.f32 %v1401_v7, %v1632_v8 }
 0x118   : > { %v1318_v61 = vpop.f32.mrf.mxu2  ;;  %v1575_v62 = vpop.f32.mrf.mxu3 }
 0x119   : > { %v1319_v1 = vadd.f32 %v2710_v37, %v1318_v61  ;;  %v1576_v2 = vadd.f32 %v2710_v37, %v1575_v62  ;;  %v833_v3 = vpop.f32.mrf.mxu0  ;;  %v1064_v4 = vpop.f32.mrf.mxu1 }
 0x11a   : > { %v834_v13 = vadd.f32 %v2710_v37, %v833_v3  ;;  %v1065_v14 = vadd.f32 %v2710_v37, %v1064_v4 }
 0x11b   : > { %v1376_v10 = vmax.f32 %v1319_v1, 0.0  ;;  %v1633_v12 = vmax.f32 %v1576_v2, 0.0 }
 0x11c   : > { %1904 = vmatmul.msk.bf16.gmra.mxu0 %vm762_vm2, %v2199_v63  ;;  %1995 = vmatmul.msk.bf16.gmra.mxu1 %vm762_vm2, %v2212_v0  ;;  %v889_v22 = vmax.f32 %v834_v13, 0.0  ;;  %v1120_v23 = vmax.f32 %v1065_v14, 0.0 }
 0x11d   : > { %v1402_v11 = vmax.f32 %v1145_v9, %v1376_v10  ;;  %2086 = vmatmul.msk.bf16.gmra.mxu2 %vm762_vm2, %v2225_v5  ;;  %2177 = vmatmul.msk.bf16.gmra.mxu3 %vm762_vm2, %v2238_v6 }
 0x11e   : > { %v1146_v27 = vmax.f32 %v889_v22, %v1120_v23 }
 0x11f   : > { %v1659_v16 = vmax.f32 %v1402_v11, %v1633_v12 }
 0x120   : > { %v1321_v17 = vpop.f32.mrf.mxu2  ;;  %v1578_v18 = vpop.f32.mrf.mxu3 }
 0x121   : > { %v2254_v19 = vpack.c.bf16 %v1659_v16, %v1658_v15  ;;  %v835_v20 = vpop.f32.mrf.mxu0  ;;  %v1066_v21 = vpop.f32.mrf.mxu1  ;;  %v1322_v24 = vadd.f32 %v2710_v37, %v1321_v17  ;;  %v1579_v29 = vadd.f32 %v2710_v37, %v1578_v18 }
 0x122   : > { %v836_v25 = vadd.f32 %v2710_v37, %v835_v20  ;;  %v1067_v26 = vadd.f32 %v2710_v37, %v1066_v21 }
 0x123   : > { %2307 = vst [vmem:[%s2735_s4 + $0x10] sm:$0xff] %v2254_v19   ;;  %v1377_v28 = vmax.f32 %v1322_v24, 0.0  ;;  %v1634_v44 = vmax.f32 %v1579_v29, 0.0 }
 0x124   : > { %v890_v30 = vmax.f32 %v836_v25, 0.0  ;;  %v1121_v31 = vmax.f32 %v1067_v26, 0.0 }
 0x125   : > { %v1403_v43 = vmax.f32 %v1146_v27, %v1377_v28 }
 0x126   : > { %v1147_v45 = vmax.f32 %v890_v30, %v1121_v31 }
 0x127   : > { %v1660_v51 = vmax.f32 %v1403_v43, %v1634_v44 }
 0x128   : > { %v1323_v32 = vpop.f32.mrf.mxu2  ;;  %v1580_v33 = vpop.f32.mrf.mxu3 }
 0x129   : > { %v1324_v36 = vadd.f32 %v2710_v37, %v1323_v32  ;;  %v1581_v38 = vadd.f32 %v2710_v37, %v1580_v33  ;;  %v838_v39 = vpop.f32.mrf.mxu0  ;;  %v1069_v40 = vpop.f32.mrf.mxu1 }
 0x12a   : > { %v839_v49 = vadd.f32 %v2710_v37, %v838_v39  ;;  %v1070_v50 = vadd.f32 %v2710_v37, %v1069_v40 }
 0x12b   : > { %v1378_v46 = vmax.f32 %v1324_v36, 0.0  ;;  %v1635_v48 = vmax.f32 %v1581_v38, 0.0 }
 0x12c   : > { %1905 = vmatmul.msk.bf16.gmra.mxu0 %vm762_vm2, %v2200_v34  ;;  %1996 = vmatmul.msk.bf16.gmra.mxu1 %vm762_vm2, %v2213_v35  ;;  %v891_v58 = vmax.f32 %v839_v49, 0.0  ;;  %v1122_v59 = vmax.f32 %v1070_v50, 0.0 }
 0x12d   : > { %v1404_v47 = vmax.f32 %v1147_v45, %v1378_v46  ;;  %2087 = vmatmul.msk.bf16.gmra.mxu2 %vm762_vm2, %v2226_v41  ;;  %2178 = vmatmul.msk.bf16.gmra.mxu3 %vm762_vm2, %v2239_v42 }
 0x12e   : > { %v1148_v63 = vmax.f32 %v891_v58, %v1122_v59 }
 0x12f   : > { %v1661_v52 = vmax.f32 %v1404_v47, %v1635_v48 }
 0x130   : > { %v1326_v53 = vpop.f32.mrf.mxu2  ;;  %v1583_v54 = vpop.f32.mrf.mxu3 }
 0x131   : > { %v2259_v55 = vpack.c.bf16 %v1661_v52, %v1660_v51  ;;  %v840_v56 = vpop.f32.mrf.mxu0  ;;  %v1071_v57 = vpop.f32.mrf.mxu1  ;;  %v1327_v60 = vadd.f32 %v2710_v37, %v1326_v53  ;;  %v1584_v1 = vadd.f32 %v2710_v37, %v1583_v54 }
 0x132   : > { %v841_v61 = vadd.f32 %v2710_v37, %v840_v56  ;;  %v1072_v62 = vadd.f32 %v2710_v37, %v1071_v57 }
 0x133   : > { %2308 = vst [vmem:[%s2735_s4 + $0x18] sm:$0xff] %v2259_v55   ;;  %v1379_v0 = vmax.f32 %v1327_v60, 0.0  ;;  %v1636_v11 = vmax.f32 %v1584_v1, 0.0 }
 0x134   : > { %v892_v2 = vmax.f32 %v841_v61, 0.0  ;;  %v1123_v3 = vmax.f32 %v1072_v62, 0.0 }
 0x135   : > { %v1405_v10 = vmax.f32 %v1148_v63, %v1379_v0 }
 0x136   : > { %v1149_v12 = vmax.f32 %v892_v2, %v1123_v3 }
 0x137   : > { %v1662_v18 = vmax.f32 %v1405_v10, %v1636_v11 }
 0x138   : > { %v1328_v4 = vpop.f32.mrf.mxu2  ;;  %v1585_v5 = vpop.f32.mrf.mxu3 }
 0x139   : > { %v1329_v6 = vadd.f32 %v2710_v37, %v1328_v4  ;;  %v1586_v7 = vadd.f32 %v2710_v37, %v1585_v5  ;;  %v843_v8 = vpop.f32.mrf.mxu0  ;;  %v1074_v9 = vpop.f32.mrf.mxu1 }
 0x13a   : > { %v844_v16 = vadd.f32 %v2710_v37, %v843_v8  ;;  %v1075_v17 = vadd.f32 %v2710_v37, %v1074_v9 }
 0x13b   : > { %v1380_v13 = vmax.f32 %v1329_v6, 0.0  ;;  %v1637_v15 = vmax.f32 %v1586_v7, 0.0 }
 0x13c   : > { %v893_v25 = vmax.f32 %v844_v16, 0.0  ;;  %v1124_v26 = vmax.f32 %v1075_v17, 0.0 }
 0x13d   : > { %v1406_v14 = vmax.f32 %v1149_v12, %v1380_v13 }
 0x13e   : > { %v1150_v30 = vmax.f32 %v893_v25, %v1124_v26 }
 0x13f   : > { %v1663_v19 = vmax.f32 %v1406_v14, %v1637_v15 }
 0x140   : > { %v1331_v20 = vpop.f32.mrf.mxu2  ;;  %v1588_v21 = vpop.f32.mrf.mxu3 }
 0x141   : > { %v2264_v22 = vpack.c.bf16 %v1663_v19, %v1662_v18  ;;  %v845_v23 = vpop.f32.mrf.mxu0  ;;  %v1076_v24 = vpop.f32.mrf.mxu1  ;;  %v1332_v27 = vadd.f32 %v2710_v37, %v1331_v20  ;;  %v1589_v32 = vadd.f32 %v2710_v37, %v1588_v21 }
 0x142   : > { %v846_v28 = vadd.f32 %v2710_v37, %v845_v23  ;;  %v1077_v29 = vadd.f32 %v2710_v37, %v1076_v24 }
 0x143   : > { %2309 = vst [vmem:[%s2735_s4 + $0x20] sm:$0xff] %v2264_v22   ;;  %v1381_v31 = vmax.f32 %v1332_v27, 0.0  ;;  %v1638_v43 = vmax.f32 %v1589_v32, 0.0 }
 0x144   : > { %v894_v33 = vmax.f32 %v846_v28, 0.0  ;;  %v1125_v34 = vmax.f32 %v1077_v29, 0.0 }
 0x145   : > { %v1407_v42 = vmax.f32 %v1150_v30, %v1381_v31 }
 0x146   : > { %v1151_v44 = vmax.f32 %v894_v33, %v1125_v34 }
 0x147   : > { %v1664_v50 = vmax.f32 %v1407_v42, %v1638_v43 }
 0x148   : > { %v1333_v35 = vpop.f32.mrf.mxu2  ;;  %v1590_v36 = vpop.f32.mrf.mxu3 }
 0x149   : > { %v1334_v38 = vadd.f32 %v2710_v37, %v1333_v35  ;;  %v1591_v39 = vadd.f32 %v2710_v37, %v1590_v36  ;;  %v848_v40 = vpop.f32.mrf.mxu0  ;;  %v1079_v41 = vpop.f32.mrf.mxu1 }
 0x14a   : > { %v849_v48 = vadd.f32 %v2710_v37, %v848_v40  ;;  %v1080_v49 = vadd.f32 %v2710_v37, %v1079_v41 }
 0x14b   : > { %v1382_v45 = vmax.f32 %v1334_v38, 0.0  ;;  %v1639_v47 = vmax.f32 %v1591_v39, 0.0 }
 0x14c   : > { %v895_v57 = vmax.f32 %v849_v48, 0.0  ;;  %v1126_v58 = vmax.f32 %v1080_v49, 0.0 }
 0x14d   : > { %v1408_v46 = vmax.f32 %v1151_v44, %v1382_v45 }
 0x14e   : > { %v1152_v62 = vmax.f32 %v895_v57, %v1126_v58 }
 0x14f   : > { %v1665_v51 = vmax.f32 %v1408_v46, %v1639_v47 }
 0x150   : > { %v1336_v52 = vpop.f32.mrf.mxu2  ;;  %v1593_v53 = vpop.f32.mrf.mxu3 }
 0x151   : > { %v2269_v54 = vpack.c.bf16 %v1665_v51, %v1664_v50  ;;  %v850_v55 = vpop.f32.mrf.mxu0  ;;  %v1081_v56 = vpop.f32.mrf.mxu1  ;;  %v1337_v59 = vadd.f32 %v2710_v37, %v1336_v52  ;;  %v1594_v0 = vadd.f32 %v2710_v37, %v1593_v53 }
 0x152   : > { %v851_v60 = vadd.f32 %v2710_v37, %v850_v55  ;;  %v1082_v61 = vadd.f32 %v2710_v37, %v1081_v56 }
 0x153   : > { %2310 = vst [vmem:[%s2735_s4 + $0x28] sm:$0xff] %v2269_v54   ;;  %v1383_v63 = vmax.f32 %v1337_v59, 0.0  ;;  %v1640_v10 = vmax.f32 %v1594_v0, 0.0 }
 0x154   : > { %v896_v1 = vmax.f32 %v851_v60, 0.0  ;;  %v1127_v2 = vmax.f32 %v1082_v61, 0.0 }
 0x155   : > { %v1409_v9 = vmax.f32 %v1152_v62, %v1383_v63 }
 0x156   : > { %v1153_v11 = vmax.f32 %v896_v1, %v1127_v2 }
 0x157   : > { %v1666_v17 = vmax.f32 %v1409_v9, %v1640_v10 }
 0x158   : > { %v1338_v3 = vpop.f32.mrf.mxu2  ;;  %v1595_v4 = vpop.f32.mrf.mxu3 }
 0x159   : > { %v1339_v5 = vadd.f32 %v2710_v37, %v1338_v3  ;;  %v1596_v6 = vadd.f32 %v2710_v37, %v1595_v4  ;;  %v853_v7 = vpop.f32.mrf.mxu0  ;;  %v1084_v8 = vpop.f32.mrf.mxu1 }
 0x15a   : > { %v854_v15 = vadd.f32 %v2710_v37, %v853_v7  ;;  %v1085_v16 = vadd.f32 %v2710_v37, %v1084_v8 }
 0x15b   : > { %v1384_v12 = vmax.f32 %v1339_v5, 0.0  ;;  %v1641_v14 = vmax.f32 %v1596_v6, 0.0 }
 0x15c   : > { %v897_v24 = vmax.f32 %v854_v15, 0.0  ;;  %v1128_v25 = vmax.f32 %v1085_v16, 0.0 }
 0x15d   : > { %v1410_v13 = vmax.f32 %v1153_v11, %v1384_v12 }
 0x15e   : > { %v1154_v29 = vmax.f32 %v897_v24, %v1128_v25 }
 0x15f   : > { %v1667_v18 = vmax.f32 %v1410_v13, %v1641_v14 }
 0x160   : > { %v1341_v19 = vpop.f32.mrf.mxu2  ;;  %v1598_v20 = vpop.f32.mrf.mxu3 }
 0x161   : > { %v2274_v21 = vpack.c.bf16 %v1667_v18, %v1666_v17  ;;  %v855_v22 = vpop.f32.mrf.mxu0  ;;  %v1086_v23 = vpop.f32.mrf.mxu1  ;;  %v1342_v26 = vadd.f32 %v2710_v37, %v1341_v19  ;;  %v1599_v31 = vadd.f32 %v2710_v37, %v1598_v20 }
 0x162   : > { %v856_v27 = vadd.f32 %v2710_v37, %v855_v22  ;;  %v1087_v28 = vadd.f32 %v2710_v37, %v1086_v23 }
 0x163   : > { %2311 = vst [vmem:[%s2735_s4 + $0x30] sm:$0xff] %v2274_v21   ;;  %v1385_v30 = vmax.f32 %v1342_v26, 0.0  ;;  %v1642_v42 = vmax.f32 %v1599_v31, 0.0 }
 0x164   : > { %v898_v32 = vmax.f32 %v856_v27, 0.0  ;;  %v1129_v33 = vmax.f32 %v1087_v28, 0.0 }
 0x165   : > { %v1411_v41 = vmax.f32 %v1154_v29, %v1385_v30 }
 0x166   : > { %v1155_v43 = vmax.f32 %v898_v32, %v1129_v33 }
 0x167   : > { %v1668_v49 = vmax.f32 %v1411_v41, %v1642_v42 }
 0x168   : > { %v1343_v34 = vpop.f32.mrf.mxu2  ;;  %v1600_v35 = vpop.f32.mrf.mxu3 }
 0x169   : > { %v1344_v36 = vadd.f32 %v2710_v37, %v1343_v34  ;;  %v1601_v38 = vadd.f32 %v2710_v37, %v1600_v35  ;;  %v858_v39 = vpop.f32.mrf.mxu0  ;;  %v1089_v40 = vpop.f32.mrf.mxu1 }
 0x16a   : > { %v859_v47 = vadd.f32 %v2710_v37, %v858_v39  ;;  %v1090_v48 = vadd.f32 %v2710_v37, %v1089_v40 }
 0x16b   : > { %v1386_v44 = vmax.f32 %v1344_v36, 0.0  ;;  %v1643_v46 = vmax.f32 %v1601_v38, 0.0 }
 0x16c   : > { %v899_v56 = vmax.f32 %v859_v47, 0.0  ;;  %v1130_v57 = vmax.f32 %v1090_v48, 0.0 }
 0x16d   : > { %v1412_v45 = vmax.f32 %v1155_v43, %v1386_v44 }
 0x16e   : > { %v1156_v61 = vmax.f32 %v899_v56, %v1130_v57 }
 0x16f   : > { %v1669_v50 = vmax.f32 %v1412_v45, %v1643_v46 }
 0x170   : > { %v1346_v51 = vpop.f32.mrf.mxu2  ;;  %v1603_v52 = vpop.f32.mrf.mxu3 }
 0x171   : > { %v2279_v53 = vpack.c.bf16 %v1669_v50, %v1668_v49  ;;  %v860_v54 = vpop.f32.mrf.mxu0  ;;  %v1091_v55 = vpop.f32.mrf.mxu1  ;;  %v1347_v58 = vadd.f32 %v2710_v37, %v1346_v51  ;;  %v1604_v63 = vadd.f32 %v2710_v37, %v1603_v52 }
 0x172   : > { %v861_v59 = vadd.f32 %v2710_v37, %v860_v54  ;;  %v1092_v60 = vadd.f32 %v2710_v37, %v1091_v55 }
 0x173   : > { %2312 = vst [vmem:[%s2735_s4 + $0x38] sm:$0xff] %v2279_v53   ;;  %v1387_v62 = vmax.f32 %v1347_v58, 0.0  ;;  %v1644_v9 = vmax.f32 %v1604_v63, 0.0 }
 0x174   : > { %v900_v0 = vmax.f32 %v861_v59, 0.0  ;;  %v1131_v1 = vmax.f32 %v1092_v60, 0.0 }
 0x175   : > { %v1413_v8 = vmax.f32 %v1156_v61, %v1387_v62 }
 0x176   : > { %v1157_v10 = vmax.f32 %v900_v0, %v1131_v1 }
 0x177   : > { %v1670_v16 = vmax.f32 %v1413_v8, %v1644_v9 }
 0x178   : > { %v1348_v2 = vpop.f32.mrf.mxu2  ;;  %v1605_v3 = vpop.f32.mrf.mxu3 }
 0x179   : > { %v1349_v4 = vadd.f32 %v2710_v37, %v1348_v2  ;;  %v1606_v5 = vadd.f32 %v2710_v37, %v1605_v3  ;;  %v863_v6 = vpop.f32.mrf.mxu0  ;;  %v1094_v7 = vpop.f32.mrf.mxu1 }
 0x17a   : > { %v864_v14 = vadd.f32 %v2710_v37, %v863_v6  ;;  %v1095_v15 = vadd.f32 %v2710_v37, %v1094_v7 }
 0x17b   : > { %v1388_v11 = vmax.f32 %v1349_v4, 0.0  ;;  %v1645_v13 = vmax.f32 %v1606_v5, 0.0 }
 0x17c   : > { %v901_v23 = vmax.f32 %v864_v14, 0.0  ;;  %v1132_v24 = vmax.f32 %v1095_v15, 0.0 }
 0x17d   : > { %v1414_v12 = vmax.f32 %v1157_v10, %v1388_v11 }
 0x17e   : > { %v1158_v28 = vmax.f32 %v901_v23, %v1132_v24 }
 0x17f   : > { %v1671_v17 = vmax.f32 %v1414_v12, %v1645_v13 }
 0x180   : > { %v1351_v18 = vpop.f32.mrf.mxu2  ;;  %v1608_v19 = vpop.f32.mrf.mxu3 }
 0x181   : > { %v2284_v20 = vpack.c.bf16 %v1671_v17, %v1670_v16  ;;  %v865_v21 = vpop.f32.mrf.mxu0  ;;  %v1096_v22 = vpop.f32.mrf.mxu1  ;;  %v1352_v25 = vadd.f32 %v2710_v37, %v1351_v18  ;;  %v1609_v30 = vadd.f32 %v2710_v37, %v1608_v19 }
 0x182   : > { %v866_v26 = vadd.f32 %v2710_v37, %v865_v21  ;;  %v1097_v27 = vadd.f32 %v2710_v37, %v1096_v22 }
 0x183   : > { %2313 = vst [vmem:[%s2735_s4 + $0x40] sm:$0xff] %v2284_v20   ;;  %v1389_v29 = vmax.f32 %v1352_v25, 0.0  ;;  %v1646_v41 = vmax.f32 %v1609_v30, 0.0 }
 0x184   : > { %v902_v31 = vmax.f32 %v866_v26, 0.0  ;;  %v1133_v32 = vmax.f32 %v1097_v27, 0.0 }
 0x185   : > { %v1415_v40 = vmax.f32 %v1158_v28, %v1389_v29 }
 0x186   : > { %v1159_v42 = vmax.f32 %v902_v31, %v1133_v32 }
 0x187   : > { %v1672_v48 = vmax.f32 %v1415_v40, %v1646_v41 }
 0x188   : > { %v1353_v33 = vpop.f32.mrf.mxu2  ;;  %v1610_v34 = vpop.f32.mrf.mxu3 }
 0x189   : > { %v1354_v35 = vadd.f32 %v2710_v37, %v1353_v33  ;;  %v1611_v36 = vadd.f32 %v2710_v37, %v1610_v34  ;;  %v868_v38 = vpop.f32.mrf.mxu0  ;;  %v1099_v39 = vpop.f32.mrf.mxu1 }
 0x18a   : > { %v869_v46 = vadd.f32 %v2710_v37, %v868_v38  ;;  %v1100_v47 = vadd.f32 %v2710_v37, %v1099_v39 }
 0x18b   : > { %v1390_v43 = vmax.f32 %v1354_v35, 0.0  ;;  %v1647_v45 = vmax.f32 %v1611_v36, 0.0 }
 0x18c   : > { %v903_v55 = vmax.f32 %v869_v46, 0.0  ;;  %v1134_v56 = vmax.f32 %v1100_v47, 0.0 }
 0x18d   : > { %v1416_v44 = vmax.f32 %v1159_v42, %v1390_v43 }
 0x18e   : > { %v1160_v60 = vmax.f32 %v903_v55, %v1134_v56 }
 0x18f   : > { %v1673_v49 = vmax.f32 %v1416_v44, %v1647_v45 }
 0x190   : > { %v1356_v50 = vpop.f32.mrf.mxu2  ;;  %v1613_v51 = vpop.f32.mrf.mxu3 }
 0x191   : > { %v2289_v52 = vpack.c.bf16 %v1673_v49, %v1672_v48  ;;  %v870_v53 = vpop.f32.mrf.mxu0  ;;  %v1101_v54 = vpop.f32.mrf.mxu1  ;;  %v1357_v57 = vadd.f32 %v2710_v37, %v1356_v50  ;;  %v1614_v62 = vadd.f32 %v2710_v37, %v1613_v51 }
 0x192   : > { %v871_v58 = vadd.f32 %v2710_v37, %v870_v53  ;;  %v1102_v59 = vadd.f32 %v2710_v37, %v1101_v54 }
 0x193   : > { %2314 = vst [vmem:[%s2735_s4 + $0x48] sm:$0xff] %v2289_v52   ;;  %v1391_v61 = vmax.f32 %v1357_v57, 0.0  ;;  %v1648_v8 = vmax.f32 %v1614_v62, 0.0 }
 0x194   : > { %v904_v63 = vmax.f32 %v871_v58, 0.0  ;;  %v1135_v0 = vmax.f32 %v1102_v59, 0.0 }
 0x195   : > { %v1417_v7 = vmax.f32 %v1160_v60, %v1391_v61 }
 0x196   : > { %v1161_v9 = vmax.f32 %v904_v63, %v1135_v0 }
 0x197   : > { %v1674_v15 = vmax.f32 %v1417_v7, %v1648_v8 }
 0x198   : > { %v1358_v1 = vpop.f32.mrf.mxu2  ;;  %v1615_v2 = vpop.f32.mrf.mxu3 }
 0x199   : > { %v1359_v3 = vadd.f32 %v2710_v37, %v1358_v1  ;;  %v1616_v4 = vadd.f32 %v2710_v37, %v1615_v2  ;;  %v873_v5 = vpop.f32.mrf.mxu0  ;;  %v1104_v6 = vpop.f32.mrf.mxu1 }
 0x19a   : > { %v874_v13 = vadd.f32 %v2710_v37, %v873_v5  ;;  %v1105_v14 = vadd.f32 %v2710_v37, %v1104_v6 }
 0x19b   : > { %v1392_v10 = vmax.f32 %v1359_v3, 0.0  ;;  %v1649_v12 = vmax.f32 %v1616_v4, 0.0 }
 0x19c   : > { %v905_v22 = vmax.f32 %v874_v13, 0.0  ;;  %v1136_v23 = vmax.f32 %v1105_v14, 0.0 }
 0x19d   : > { %v1418_v11 = vmax.f32 %v1161_v9, %v1392_v10 }
 0x19e   : > { %v1162_v27 = vmax.f32 %v905_v22, %v1136_v23 }
 0x19f   : > { %v1675_v16 = vmax.f32 %v1418_v11, %v1649_v12 }
 0x1a0   : > { %v1361_v17 = vpop.f32.mrf.mxu2  ;;  %v1618_v18 = vpop.f32.mrf.mxu3 }
 0x1a1   : > { %v2294_v19 = vpack.c.bf16 %v1675_v16, %v1674_v15  ;;  %v875_v20 = vpop.f32.mrf.mxu0  ;;  %v1106_v21 = vpop.f32.mrf.mxu1  ;;  %v1362_v24 = vadd.f32 %v2710_v37, %v1361_v17  ;;  %v1619_v29 = vadd.f32 %v2710_v37, %v1618_v18 }
 0x1a2   : > { %v876_v25 = vadd.f32 %v2710_v37, %v875_v20  ;;  %v1107_v26 = vadd.f32 %v2710_v37, %v1106_v21 }
 0x1a3   : > { %2315 = vst [vmem:[%s2735_s4 + $0x50] sm:$0xff] %v2294_v19   ;;  %v1393_v28 = vmax.f32 %v1362_v24, 0.0  ;;  %v1650_v40 = vmax.f32 %v1619_v29, 0.0 }
 0x1a4   : > { %v906_v30 = vmax.f32 %v876_v25, 0.0  ;;  %v1137_v31 = vmax.f32 %v1107_v26, 0.0 }
 0x1a5   : > { %v1419_v39 = vmax.f32 %v1162_v27, %v1393_v28 }
 0x1a6   : > { %v1163_v41 = vmax.f32 %v906_v30, %v1137_v31 }
 0x1a7   : > { %v1676_v47 = vmax.f32 %v1419_v39, %v1650_v40 }
 0x1a8   : > { %v1363_v32 = vpop.f32.mrf.mxu2  ;;  %v1620_v33 = vpop.f32.mrf.mxu3 }
 0x1a9   : > { %v1364_v34 = vadd.f32 %v2710_v37, %v1363_v32  ;;  %v1621_v35 = vadd.f32 %v2710_v37, %v1620_v33  ;;  %v878_v36 = vpop.f32.mrf.mxu0  ;;  %v1109_v38 = vpop.f32.mrf.mxu1 }
 0x1aa   : > { %v879_v45 = vadd.f32 %v2710_v37, %v878_v36  ;;  %v1110_v46 = vadd.f32 %v2710_v37, %v1109_v38 }
 0x1ab   : > { %v1394_v42 = vmax.f32 %v1364_v34, 0.0  ;;  %v1651_v44 = vmax.f32 %v1621_v35, 0.0 }
 0x1ac   : > { %v907_v54 = vmax.f32 %v879_v45, 0.0  ;;  %v1138_v55 = vmax.f32 %v1110_v46, 0.0 }
 0x1ad   : > { %v1420_v43 = vmax.f32 %v1163_v41, %v1394_v42 }
 0x1ae   : > { %v1164_v59 = vmax.f32 %v907_v54, %v1138_v55 }
 0x1af   : > { %v1677_v48 = vmax.f32 %v1420_v43, %v1651_v44 }
 0x1b0   : > { %v1366_v49 = vpop.f32.mrf.mxu2  ;;  %v1623_v50 = vpop.f32.mrf.mxu3 }
 0x1b1   : > { %v2299_v51 = vpack.c.bf16 %v1677_v48, %v1676_v47  ;;  %v880_v52 = vpop.f32.mrf.mxu0  ;;  %v1111_v53 = vpop.f32.mrf.mxu1  ;;  %v1367_v56 = vadd.f32 %v2710_v37, %v1366_v49  ;;  %v1624_v61 = vadd.f32 %v2710_v37, %v1623_v50 }
 0x1b2   : > { %v881_v57 = vadd.f32 %v2710_v37, %v880_v52  ;;  %v1112_v58 = vadd.f32 %v2710_v37, %v1111_v53 }
 0x1b3   : > { %2316 = vst [vmem:[%s2735_s4 + $0x58] sm:$0xff] %v2299_v51   ;;  %v1395_v60 = vmax.f32 %v1367_v56, 0.0  ;;  %v1652_v5 = vmax.f32 %v1624_v61, 0.0 }
 0x1b4   : > { %v908_v62 = vmax.f32 %v881_v57, 0.0  ;;  %v1139_v63 = vmax.f32 %v1112_v58, 0.0 }
 0x1b5   : > { %v1421_v4 = vmax.f32 %v1164_v59, %v1395_v60 }
 0x1b6   : > { %v1165_v6 = vmax.f32 %v908_v62, %v1139_v63 }
 0x1b7   : > { %v1678_v10 = vmax.f32 %v1421_v4, %v1652_v5 }
 0x1b8   : > { %v1368_v0 = vpop.f32.mrf.mxu2  ;;  %v1625_v1 = vpop.f32.mrf.mxu3 }
 0x1b9   : > { %v1369_v2 = vadd.f32 %v2710_v37, %v1368_v0  ;;  %v1626_v3 = vadd.f32 %v2710_v37, %v1625_v1 }
 0x1bb   : > { %v1396_v7 = vmax.f32 %v1369_v2, 0.0  ;;  %v1653_v9 = vmax.f32 %v1626_v3, 0.0 }
 0x1bd   : > { %v1422_v8 = vmax.f32 %v1165_v6, %v1396_v7 }
 0x1bf   : > { %v1679_v11 = vmax.f32 %v1422_v8, %v1653_v9 }
 0x1c1   : > { %v2304_v12 = vpack.c.bf16 %v1679_v11, %v1678_v10 }
 0x1c3   : > { %2317 = vst [vmem:[%s2735_s4 + $0x60] sm:$0xff] %v2304_v12  }
 0x1c4   : > { %2391 = shalt.err (!%p2388_p5)
}
 0x1c5   : > { %s2429_s17 = smov 64   ;;  %s2430_s28 = smov 4  }
 0x1c6   : > { %2321 = dma.vmem_to_hbm [thread:$0]  (%p2489_p6), %s1746_s16, 1664, %s1748_s9, %s1733_s10, %s2429_s17, %s2429_s17, %s2430_s28  }
 0x1c7 PF: > { %s1762_s29 = sand.u32 1, %s2414_s12   ;;  %p2324_p7 = pnand %p1818_p9, %p2493_p8 }
 0x1c8   : > { %s1763_s30 = scalar_lea.sflag [#allocation4], %s1762_s29 }
 0x1c9   : > { %p2325_p10 = pneg %p2324_p7 }
 0x1cb   : > { %2409 = dma.done.wait (%p2325_p10), %s1763_s30, 1664  }
 0x1cc   : > { %2411 = vsyncadd (%p2325_p10), %s1763_s30, 4294965632  ;;  %p13_p11 = scmp.ge.s32.totalorder %s2474_s18, 4   ;;  %s2909_s12 = smov %s2418_s13 }
 0x1cd   : > { %s2910_s13 = smov %s2422_s14  ;;  %s2911_s14 = smov %s2487_s21 }
 0x1ce   : > { %s2912_s15 = smov %s2474_s18  ;;  %15 = sbr.rel (!%p13_p11) target bundleno = 3 (0x3), region = 116 }
 0x1d3   :  { %1769 = vsyncpa [#allocation4], 1 }
 0x1d4   :  { %1771 = vsyncpa [#allocation4 + $0x1], 1 }

</bundles_post_ra>
